<compile_context>
chip_gen: v5e
topology: v5e:2x2
jax: 0.10.0
libtpu: 0.0.40
codegen_flags: <defaults>
</compile_context>

<pallas_src>
import functools

import jax
import jax.numpy as jnp
from jax.experimental import pallas as pl
from jax.experimental.pallas import tpu as pltpu


def _layernorm_kernel(x_ref, a_ref, b_ref, o_ref, *, features, eps):
    # x_ref: (tile_rows, features) block in VMEM (full feature extent).
    x = x_ref[...].astype(jnp.float32)
    n = jnp.float32(features)

    # Two-pass moments on the resident tile (avoids E[x^2]-mean^2 cancellation).
    mean = jnp.sum(x, axis=-1, keepdims=True) / n
    xc = x - mean
    var = jnp.sum(xc * xc, axis=-1, keepdims=True) / (n - 1.0)  # unbiased, torch.std
    std = jnp.sqrt(var)

    # Per-row reciprocal on the EUP (exact, to hold the 1e-5 tolerance).
    inv = pl.reciprocal(std + eps, approx=False)  # (tile_rows, 1)

    a = a_ref[...].astype(jnp.float32)  # (1, features)
    b = b_ref[...].astype(jnp.float32)  # (1, features)
    # Reuse the centered tile directly; no second full-size f32 temp.
    o_ref[...] = (xc * inv * a + b).astype(o_ref.dtype)


def _vmem_config():
    """(scratch budget, scoped vmem limit) tuned per TPU generation."""
    try:
        vmem_cap = int(pltpu.get_tpu_info().vmem_capacity_bytes)
    except Exception:
        vmem_cap = 64 * 1024 * 1024  # be conservative if the query fails
    if vmem_cap >= 96 * 1024 * 1024:
        # v5e / v6e: 128 MiB physical VMEM -> tall tiles, fewer grid steps.
        return 48 * 1024 * 1024, 96 * 1024 * 1024
    # v7x: 64 MiB per TensorCore -> keep headroom for compiler scratch.
    return 24 * 1024 * 1024, 48 * 1024 * 1024


def _pick_tile_rows(rows, features, dtype_bytes, budget):
    """Largest 32-aligned row tile fitting a double-buffered VMEM budget."""
    # Physical lane width of the VMEM tile (padded to 128 lanes by the compiler).
    feat_phys = max(128, ((features + 127) // 128) * 128)
    # 2x(in tile) + 2x(out tile) in the I/O dtype, plus f32 working tiles
    # inside the body (for f32 inputs the astype is a no-op -> fewer temps).
    working_f32_tiles = 2 if dtype_bytes == 4 else 3
    bytes_per_row = feat_phys * (4 * dtype_bytes + working_f32_tiles * 4)

    t = budget // max(bytes_per_row, 1)
    t = max(32, min(int(t), 2048))
    t = (t // 32) * 32

    if t >= rows:
        # Whole problem fits in one tile.  If it is big enough, split into two
        # blocks so both v7x TensorCores (and the pipeline) get work.
        if rows >= 128:
            half = ((rows + 1) // 2 + 31) // 32 * 32
            if half < rows:
                return half
        return rows  # full-extent row block (legal for any row count)
    return t


def layer_norm(x, a_2, b_2, eps=1e-6, tile_rows=None):
    """x: (..., features); a_2, b_2: (features,). Returns same shape/dtype as x."""
    features = x.shape[-1]
    orig_shape = x.shape
    dtype = x.dtype

    x2d = x.reshape(-1, features)
    rows = x2d.shape[0]

    budget, vmem_limit = _vmem_config()
    if tile_rows is None:
        tile_rows = _pick_tile_rows(
            rows, features, jnp.dtype(dtype).itemsize, budget
        )

    grid_rows = pl.cdiv(rows, tile_rows)  # ragged last block handled by Pallas

    a2d = a_2.reshape(1, features)
    b2d = b_2.reshape(1, features)

    kernel = functools.partial(_layernorm_kernel, features=features, eps=eps)

    out = pl.pallas_call(
        kernel,
        out_shape=jax.ShapeDtypeStruct((rows, features), dtype),
        grid_spec=pltpu.PrefetchScalarGridSpec(
            num_scalar_prefetch=0,
            grid=(grid_rows,),
            in_specs=[
                pl.BlockSpec((tile_rows, features), lambda i: (i, 0)),
                pl.BlockSpec((1, features), lambda i: (0, 0)),
                pl.BlockSpec((1, features), lambda i: (0, 0)),
            ],
            out_specs=pl.BlockSpec((tile_rows, features), lambda i: (i, 0)),
        ),
        compiler_params=pltpu.CompilerParams(
            dimension_semantics=("parallel",),
            vmem_limit_bytes=vmem_limit,
        ),
    )(x2d, a2d, b2d)

    return out.reshape(orig_shape)


if __name__ == "__main__":
    key = jax.random.PRNGKey(0)
    batch, seq, features = 2, 8, 32

    x = jax.random.normal(key, (batch, seq, features), dtype=jnp.float32)
    # Deterministic parameter init, matching the module's __init__:
    a_2 = jnp.ones((features,), dtype=jnp.float32)
    b_2 = jnp.zeros((features,), dtype=jnp.float32)

    out = layer_norm(x, a_2, b_2, eps=1e-6)
    out = jax.block_until_ready(out)

    # Reference check (plain JAX, mirrors the PyTorch forward exactly):
    mean = jnp.mean(x, axis=-1, keepdims=True)
    std = jnp.sqrt(
        jnp.sum((x - mean) ** 2, axis=-1, keepdims=True) / (features - 1)
    )
    ref = a_2 * (x - mean) / (std + 1e-6) + b_2
    assert out.shape == x.shape and out.dtype == x.dtype
    assert jnp.allclose(out, ref, atol=1e-5, rtol=1e-5)

    print("KERNEL_OK")
</pallas_src>

<mosaic_0001>
module attributes {stable_mosaic.version = 11 : i64} {
  func.func @_layernorm_kernel(%arg0: i32, %arg1: memref<16x32xf32, #tpu.memory_space<vmem>>, %arg2: memref<1x32xf32, #tpu.memory_space<vmem>>, %arg3: memref<1x32xf32, #tpu.memory_space<vmem>>, %arg4: memref<16x32xf32, #tpu.memory_space<vmem>>) attributes {dimension_semantics = [#tpu.dimension_semantics<parallel>], iteration_bounds = array<i64: 1>, scalar_prefetch = 0 : i64, scratch_operands = 0 : i64, tpu.core_type = #tpu.core_type<tc>, window_params = [{transform_indices = @transform_0, window_bounds = array<i64: 16, 32>}, {pipeline_mode = #tpu.pipeline_mode<synchronous>, transform_indices = @transform_1, window_bounds = array<i64: 1, 32>}, {pipeline_mode = #tpu.pipeline_mode<synchronous>, transform_indices = @transform_2, window_bounds = array<i64: 1, 32>}, {transform_indices = @transform_3, window_bounds = array<i64: 16, 32>}]} {
    %c0 = arith.constant 0 : index
    %c0_0 = arith.constant 0 : index
    %0 = vector.load %arg1[%c0, %c0_0] : memref<16x32xf32, #tpu.memory_space<vmem>>, vector<16x32xf32>
    %cst = arith.constant dense<0.000000e+00> : vector<16xf32>
    %1 = vector.multi_reduction <add>, %0, %cst [1] : vector<16x32xf32> to vector<16xf32>
    %2 = vector.shape_cast %1 : vector<16xf32> to vector<16x1xf32>
    %cst_1 = arith.constant 3.200000e+01 : f32
    %3 = vector.broadcast %cst_1 : f32 to vector<16x1xf32>
    %4 = arith.divf %2, %3 : vector<16x1xf32>
    %5 = vector.broadcast %4 : vector<16x1xf32> to vector<16x32xf32>
    %6 = arith.subf %0, %5 : vector<16x32xf32>
    %7 = arith.mulf %6, %6 : vector<16x32xf32>
    %cst_2 = arith.constant dense<0.000000e+00> : vector<16xf32>
    %8 = vector.multi_reduction <add>, %7, %cst_2 [1] : vector<16x32xf32> to vector<16xf32>
    %9 = vector.shape_cast %8 : vector<16xf32> to vector<16x1xf32>
    %cst_3 = arith.constant 3.200000e+01 : f32
    %cst_4 = arith.constant 1.000000e+00 : f32
    %10 = arith.subf %cst_3, %cst_4 : f32
    %11 = vector.broadcast %10 : f32 to vector<16x1xf32>
    %12 = arith.divf %9, %11 : vector<16x1xf32>
    %13 = math.sqrt %12 : vector<16x1xf32>
    %cst_5 = arith.constant 9.99999997E-7 : f32
    %14 = vector.broadcast %cst_5 : f32 to vector<16x1xf32>
    %15 = arith.addf %13, %14 : vector<16x1xf32>
    %16 = tpu.reciprocal %15 : vector<16x1xf32> -> vector<16x1xf32>
    %c0_6 = arith.constant 0 : index
    %c0_7 = arith.constant 0 : index
    %17 = vector.load %arg2[%c0_6, %c0_7] : memref<1x32xf32, #tpu.memory_space<vmem>>, vector<1x32xf32>
    %c0_8 = arith.constant 0 : index
    %c0_9 = arith.constant 0 : index
    %18 = vector.load %arg3[%c0_8, %c0_9] : memref<1x32xf32, #tpu.memory_space<vmem>>, vector<1x32xf32>
    %19 = vector.broadcast %16 : vector<16x1xf32> to vector<16x32xf32>
    %20 = arith.mulf %6, %19 : vector<16x32xf32>
    %21 = vector.broadcast %17 : vector<1x32xf32> to vector<16x32xf32>
    %22 = arith.mulf %20, %21 : vector<16x32xf32>
    %23 = vector.broadcast %18 : vector<1x32xf32> to vector<16x32xf32>
    %24 = arith.addf %22, %23 : vector<16x32xf32>
    %c0_10 = arith.constant 0 : index
    %c0_11 = arith.constant 0 : index
    %25 = vector.load %arg4[%c0_10, %c0_11] : memref<16x32xf32, #tpu.memory_space<vmem>>, vector<16x32xf32>
    tpu.vector_store %arg4[%c0_10, %c0_11], %24 {strides = array<i32>} : memref<16x32xf32, #tpu.memory_space<vmem>>, vector<16x32xf32>,
    return
  }
  func.func @transform_0(%arg0: i32) -> (i32, i32) {
    %c0_i32 = arith.constant 0 : i32
    %c0_i32_0 = arith.constant 0 : i32
    return %arg0, %c0_i32 : i32, i32
  }
  func.func @transform_1(%arg0: i32) -> (i32, i32) {
    %c0_i32 = arith.constant 0 : i32
    %c0_i32_0 = arith.constant 0 : i32
    %c0_i32_1 = arith.constant 0 : i32
    return %c0_i32, %c0_i32_0 : i32, i32
  }
  func.func @transform_2(%arg0: i32) -> (i32, i32) {
    %c0_i32 = arith.constant 0 : i32
    %c0_i32_0 = arith.constant 0 : i32
    %c0_i32_1 = arith.constant 0 : i32
    return %c0_i32, %c0_i32_0 : i32, i32
  }
  func.func @transform_3(%arg0: i32) -> (i32, i32) {
    %c0_i32 = arith.constant 0 : i32
    %c0_i32_0 = arith.constant 0 : i32
    return %arg0, %c0_i32 : i32, i32
  }
}

</mosaic_0001>

<bundles_post_ra>
// kernel: tpu_custom_call.1
= control target key start
LH: loop header
LB: loop body
LE: loop exit
PB: predicated region body
PF: predicated region fallthrough
CT: control target
= control target key end

     0   :  { %8 = vsyncpa [#allocation3], 0  ;;  %s332_s0 = inlined_call_operand.hbm [shape: f32[16,32], index: 0, kind: input, shape index: {}]   ;;  %s333_s1 = inlined_call_operand.hbm [shape: f32[1,32], index: 1, kind: input, shape index: {}]   ;;  %s334_s2 = inlined_call_operand.vmem [shape: f32[1,32], index: 2, kind: input, shape index: {}]   ;;  %s335_s3 = inlined_call_operand.hbm [shape: f32[16,32], index: 3, kind: output, shape index: {}]  }
   0x1   :  { %9 = vsyncpa [#allocation6], 0 }
   0x2   :  { %10 = vsyncpa [#allocation4], 0  ;;  %s15_s14 = sshll.u32 %s332_s0, 4  ;;  %s271_s15 = smov [#allocation2]   ;;  %s16_s14 = int_to_ptr.hbm [resolvable:$true] %s15_s14 }
   0x3   :  { %s17_s16 = sshll.u32 %s271_s15, 4  ;;  %s29_s19 = sshll.u32 %s333_s1, 4  ;;  %s18_s16 = int_to_ptr.vmem [resolvable:$true] %s17_s16  ;;  %s30_s19 = int_to_ptr.hbm [resolvable:$true] %s29_s19 }
   0x4   :  { %s272_s20 = smov 128   ;;  %s273_s21 = smov 8  }
   0x5   :  { %23 = dma.hbm_to_vmem [thread:$0]  %s16_s14, 256, %s18_s16, [#allocation3], %s272_s20, %s272_s20, %s273_s21  }
   0x6   :  { %s274_s22 = smov [#allocation5]  }
   0x7   :  { %s31_s23 = sshll.u32 %s274_s22, 4  ;;  %s32_s23 = int_to_ptr.vmem [resolvable:$true] %s31_s23 }
   0x8   :  { %34 = dma.hbm_to_vmem [thread:$0]  %s30_s19, 16, %s32_s23, [#allocation6]  }
   0x9   :  { %265 = dma.done.wait [#allocation3], 256  }
   0xa   :  { %266 = vsyncadd [#allocation3], 4294967040 }
   0xb   :  { %267 = dma.done.wait [#allocation6], 16  }
   0xc   :  { %268 = vsyncadd [#allocation6], 4294967280  ;;  %vm47_vm0 = vcmask 261120   ;;  %v45_v0 = vld [vmem:[#allocation2] sm:$0xff]  ;;  %v46_v2 = vld [vmem:[#allocation2 + $0x8] sm:$0xff]  ;;  %v275_v4 = vmov 32.0  }
   0xd   :  { %v48_v1 = vsel %vm47_vm0, %v45_v0, 0.0  ;;  %v51_v3 = vsel %vm47_vm0, %v46_v2, 0.0  ;;  %181 = vrcp.f32 %v275_v4  ;;  %v276_v21 = vmov 31.0   ;;  %s277_s24 = smov [#allocation7]   ;;  %s158_s27 = sshll.u32 %s335_s3, 4  ;;  %s159_s27 = int_to_ptr.hbm [resolvable:$true] %s158_s27 }
   0xe   :  { %49 = vadd.xlane.f32.xlu0 %v48_v1  ;;  %183 = vrcp.f32 %v276_v21  ;;  %v179_v1 = vld [vmem:[#allocation5] ss:$0 sm:$0xff]  ;;  %s156_s25 = sshll.u32 %s277_s24, 4  ;;  %s157_s25 = int_to_ptr.vmem [resolvable:$true] %s156_s25 }
  0x13   :  { %v182_v5 = vpop.eup %181 }
  0x14   :  { %v55_v6 = vmul.f32 32.0, %v182_v5  ;;  %vm59_vm1 = vweird.f32 %v182_v5  ;;  %v184_v22 = vpop.eup %183 }
  0x15   :  { %v74_v23 = vmul.f32 31.0, %v184_v22  ;;  %vm78_vm2 = vweird.f32 %v184_v22 }
  0x16   :  { %52 = vadd.xlane.f32.xlu0 %v51_v3  ;;  %v56_v7 = vsub.f32 1.0, %v55_v6 }
  0x17   :  { %v75_v24 = vsub.f32 1.0, %v74_v23 }
  0x18   :  { %v57_v8 = vmul.f32 %v182_v5, %v56_v7 }
  0x19   :  { %v76_v25 = vmul.f32 %v184_v22, %v75_v24 }
  0x1a   :  { %v58_v9 = vadd.f32 %v182_v5, %v57_v8 }
  0x1b   :  { %v77_v26 = vadd.f32 %v184_v22, %v76_v25 }
  0x1c   :  { %v60_v10 = vsel %vm59_vm1, %v182_v5, %v58_v9  ;;  %v180_v5 = vld [vmem:[%s334_s2] ss:$0 sm:$0xff] }
  0x1d   :  { %v79_v27 = vsel %vm78_vm2, %v184_v22, %v77_v26 }
  0x81   :  { %v50_v11 = vpop.xlane.xlu0 %49 }
  0x82   :  { %v61_v12 = vmul.f32 %v60_v10, %v50_v11 }
  0x84   :  { %v309_v13 = vsub.f32 %v45_v0, %v61_v12 }
  0x86   :  { %v65_v14 = vmul.f32 %v309_v13, %v309_v13 }
  0x88   :  { %v67_v15 = vsel %vm47_vm0, %v65_v14, 0.0 }
  0x89   :  { %68 = vadd.xlane.f32.xlu1 %v67_v15  ;;  %v53_v16 = vpop.xlane.xlu0 %52 }
  0x8a   :  { %v62_v17 = vmul.f32 %v60_v10, %v53_v16 }
  0x8c   :  { %v314_v18 = vsub.f32 %v46_v2, %v62_v17 }
  0x8e   :  { %v66_v19 = vmul.f32 %v314_v18, %v314_v18 }
  0x90   :  { %v70_v20 = vsel %vm47_vm0, %v66_v19, 0.0 }
  0x91   :  { %71 = vadd.xlane.f32.xlu1 %v70_v20 }
  0xfc   :  { %v69_v28 = vpop.xlane.xlu1 %68 }
  0xfd   :  { %v80_v29 = vmul.f32 %v79_v27, %v69_v28 }
  0xff   :  { %185 = vrsqrt.f32 %v80_v29  ;;  %vm89_vm3 = vcmp.eq.f32.partialorder %v80_v29, inf  ;;  %v92_v42 = vand.u32 2147483648, %v80_v29  ;;  %vm91_vm4 = vcmp.eq.f32.partialorder %v80_v29, 0.0 }
 0x104   :  { %v72_v30 = vpop.xlane.xlu1 %71 }
 0x105   :  { %v186_v31 = vpop.eup %185  ;;  %v81_v32 = vmul.f32 %v79_v27, %v72_v30 }
 0x106   :  { %v83_v33 = vmul.f32 %v186_v31, %v80_v29 }
 0x107   :  { %187 = vrsqrt.f32 %v81_v32  ;;  %vm101_vm5 = vcmp.eq.f32.partialorder %v81_v32, inf  ;;  %v104_v50 = vand.u32 2147483648, %v81_v32  ;;  %vm103_vm6 = vcmp.eq.f32.partialorder %v81_v32, 0.0 }
 0x108   :  { %v84_v34 = vmul.f32 %v186_v31, %v83_v33 }
 0x10a   :  { %v85_v35 = vmul.f32 0.5, %v84_v34 }
 0x10c   :  { %v86_v36 = vsub.f32 1.5, %v85_v35 }
 0x10d   :  { %v188_v37 = vpop.eup %187 }
 0x10e   :  { %v87_v38 = vmul.f32 %v186_v31, %v86_v36  ;;  %v95_v39 = vmul.f32 %v188_v37, %v81_v32 }
 0x110   :  { %v88_v40 = vmul.f32 %v87_v38, %v80_v29  ;;  %v96_v41 = vmul.f32 %v188_v37, %v95_v39 }
 0x112   :  { %v90_v43 = vsel %vm89_vm3, %v80_v29, %v88_v40  ;;  %v97_v44 = vmul.f32 0.5, %v96_v41 }
 0x113   :  { %v93_v45 = vsel %vm91_vm4, %v92_v42, %v90_v43 }
 0x114   :  { %v106_v46 = vadd.f32 1e-06, %v93_v45  ;;  %v98_v47 = vsub.f32 1.5, %v97_v44 }
 0x116   :  { %189 = vrcp.f32 %v106_v46  ;;  %v99_v48 = vmul.f32 %v188_v37, %v98_v47  ;;  %v119_v57 = vand.u32 2147483648, %v106_v46  ;;  %v117_v59 = vand.u32 2147483647, %v106_v46 }
 0x117   :  { %vm113_vm8 = vweird.f32 %v106_v46 }
 0x118   :  { %v100_v49 = vmul.f32 %v99_v48, %v81_v32  ;;  %v120_v62 = vor.u32 1.1754944e-38, %v119_v57  ;;  %vm118_vm10 = vcmp.eq.f32.partialorder %v117_v59, 8.507059e+37 }
 0x11a   :  { %v102_v51 = vsel %vm101_vm5, %v81_v32, %v100_v49 }
 0x11b   :  { %v105_v52 = vsel %vm103_vm6, %v104_v50, %v102_v51 }
 0x11c   :  { %v190_v53 = vpop.eup %189  ;;  %v107_v54 = vadd.f32 1e-06, %v105_v52 }
 0x11d   :  { %v109_v55 = vmul.f32 %v190_v53, %v106_v46  ;;  %vm114_vm7 = vweird.f32 %v190_v53 }
 0x11e   :  { %191 = vrcp.f32 %v107_v54  ;;  %vm115_vm9 = vmor %vm113_vm8, %vm114_vm7  ;;  %v133_v6 = vand.u32 2147483648, %v107_v54  ;;  %v131_v8 = vand.u32 2147483647, %v107_v54  ;;  %vm127_vm12 = vweird.f32 %v107_v54 }
 0x11f   :  { %v110_v56 = vsub.f32 1.0, %v109_v55 }
 0x120   :  { %v134_v12 = vor.u32 1.1754944e-38, %v133_v6  ;;  %vm132_vm14 = vcmp.eq.f32.partialorder %v131_v8, 8.507059e+37 }
 0x121   :  { %v111_v58 = vmul.f32 %v190_v53, %v110_v56 }
 0x123   :  { %v112_v60 = vadd.f32 %v190_v53, %v111_v58 }
 0x124   :  { %v192_v61 = vpop.eup %191 }
 0x125   :  { %v116_v63 = vsel %vm115_vm9, %v190_v53, %v112_v60  ;;  %v123_v0 = vmul.f32 %v192_v61, %v107_v54  ;;  %vm128_vm11 = vweird.f32 %v192_v61 }
 0x126   :  { %v121_v2 = vsel %vm118_vm10, %v120_v62, %v116_v63  ;;  %vm129_vm13 = vmor %vm127_vm12, %vm128_vm11 }
 0x127   :  { %v124_v3 = vsub.f32 1.0, %v123_v0  ;;  %v138_v4 = vmul.f32 %v121_v2, %v309_v13 }
 0x129   :  { %v125_v7 = vmul.f32 %v192_v61, %v124_v3  ;;  %v143_v9 = vmul.f32 %v179_v1, %v138_v4 }
 0x12b   :  { %v126_v10 = vadd.f32 %v192_v61, %v125_v7  ;;  %v148_v11 = vadd.f32 %v180_v5, %v143_v9 }
 0x12d   :  { %v130_v14 = vsel %vm129_vm13, %v192_v61, %v126_v10  ;;  %150 = vst.msk [vmem:[#allocation7] sm:$0xff] %vm47_vm0, %v148_v11 }
 0x12e   :  { %v135_v15 = vsel %vm132_vm14, %v134_v12, %v130_v14 }
 0x12f   :  { %v139_v13 = vmul.f32 %v135_v15, %v314_v18 }
 0x131   :  { %v144_v16 = vmul.f32 %v179_v1, %v139_v13 }
 0x133   :  { %v149_v17 = vadd.f32 %v180_v5, %v144_v16 }
 0x135   :  { %151 = vst.msk [vmem:[#allocation7 + $0x8] sm:$0xff] %vm47_vm0, %v149_v17 }
 0x136   :  { %164 = dma.vmem_to_hbm [thread:$0]  %s157_s25, 256, %s159_s27, [#allocation4], %s272_s20, %s272_s20, %s273_s21  }
 0x137   :  { %269 = dma.done.wait [#allocation4], 256  }
 0x138   :  { %270 = vsyncadd [#allocation4], 4294967040 }
 0x139   :  { %169 = vsyncpa [#allocation3], 1 }
 0x13a   :  { %170 = vsyncpa [#allocation6], 1 }
 0x13b   :  { %171 = vsyncpa [#allocation4], 1 }

</bundles_post_ra>
